<compile_context>
chip_gen: v7x
topology: tpu7x:2x2x1
jax: 0.10.0
libtpu: 0.0.40
codegen_flags: <defaults>
</compile_context>

<pallas_src>
import jax
import jax.numpy as jnp
from jax.experimental import pallas as pl
from jax.experimental.pallas import tpu as pltpu

_EPS = 1e-10


def _natlog_kernel(x_ref, o_ref):
    x = x_ref[...]
    mask = (x > 0.0).astype(jnp.float32)           # VPU compare + select
    # relu(x) + eps, then log (EUP transcendental), then mask multiply.
    o_ref[...] = jnp.log(jnp.maximum(x, 0.0) + _EPS) * mask


def nat_logarithm(x, *, cols=512, max_block_rows=512):
    """Elementwise NatLogarithm on any-shaped input, via a tiled Pallas kernel."""
    orig_shape = x.shape
    orig_dtype = x.dtype
    flat = jnp.ravel(x).astype(jnp.float32)
    n = flat.size

    # Lane-dense 2-D layout: (rows, cols) with cols a multiple of 128.
    rows = pl.cdiv(n, cols)
    block_rows = min(max_block_rows, rows)          # full-dim block if small,
    rows_padded = pl.cdiv(rows, block_rows) * block_rows  # else multiple of 8
    pad = rows_padded * cols - n
    if pad:
        # Pad with 1.0 so the padded region stays finite (it is sliced off).
        flat = jnp.concatenate([flat, jnp.ones((pad,), jnp.float32)])
    x2d = flat.reshape(rows_padded, cols)

    grid = (rows_padded // block_rows,)
    out2d = pl.pallas_call(
        _natlog_kernel,
        out_shape=jax.ShapeDtypeStruct((rows_padded, cols), jnp.float32),
        grid_spec=pltpu.PrefetchScalarGridSpec(
            num_scalar_prefetch=0,
            grid=grid,
            in_specs=[pl.BlockSpec((block_rows, cols), lambda i: (i, 0))],
            out_specs=pl.BlockSpec((block_rows, cols), lambda i: (i, 0)),
        ),
        compiler_params=pltpu.CompilerParams(
            dimension_semantics=("parallel",),      # shard rows across TCs (v7x)
            vmem_limit_bytes=32 * 1024 * 1024,      # safe on v5e/v6e/v7x
        ),
    )(x2d)

    out = out2d.reshape(-1)[:n].reshape(orig_shape)
    return out.astype(orig_dtype)


def _reference(x):
    """Pure-jnp reference mirroring the PyTorch forward."""
    mask = jnp.where(x > 0.0, 1.0, 0.0)
    return jnp.log(jnp.maximum(x, 0.0) + _EPS) * mask


if __name__ == "__main__":
    key = jax.random.PRNGKey(0)
    # Small shape consistent with the elementwise module: batch=2, C=4, 16x16.
    x = jax.random.normal(key, (2, 4, 16, 16), jnp.float32)

    out = nat_logarithm(x)
    jax.block_until_ready(out)

    assert out.shape == x.shape, out.shape
    ref = _reference(x)
    assert bool(jnp.all(jnp.isfinite(out))), "non-finite values in output"
    assert bool(jnp.allclose(out, ref, atol=1e-6, rtol=1e-6)), "mismatch vs reference"
    print("KERNEL_OK")
</pallas_src>

<mosaic_0001>
module attributes {stable_mosaic.version = 11 : i64} {
  func.func @_natlog_kernel(%arg0: i32, %arg1: memref<4x512xf32, #tpu.memory_space<vmem>>, %arg2: memref<4x512xf32, #tpu.memory_space<vmem>>) attributes {dimension_semantics = [#tpu.dimension_semantics<parallel>], iteration_bounds = array<i64: 1>, scalar_prefetch = 0 : i64, scratch_operands = 0 : i64, tpu.core_type = #tpu.core_type<tc>, window_params = [{transform_indices = @transform_0, window_bounds = array<i64: 4, 512>}, {transform_indices = @transform_1, window_bounds = array<i64: 4, 512>}]} {
    %c0 = arith.constant 0 : index
    %c0_0 = arith.constant 0 : index
    %0 = vector.load %arg1[%c0, %c0_0] : memref<4x512xf32, #tpu.memory_space<vmem>>, vector<4x512xf32>
    %cst = arith.constant 0.000000e+00 : f32
    %1 = vector.broadcast %cst : f32 to vector<4x512xf32>
    %2 = arith.cmpf ogt, %0, %1 : vector<4x512xf32>
    %3 = arith.extui %2 : vector<4x512xi1> to vector<4x512xi32>
    %4 = arith.sitofp %3 : vector<4x512xi32> to vector<4x512xf32>
    %cst_1 = arith.constant 0.000000e+00 : f32
    %5 = vector.broadcast %cst_1 : f32 to vector<4x512xf32>
    %6 = arith.maximumf %0, %5 : vector<4x512xf32>
    %cst_2 = arith.constant 1.000000e-10 : f32
    %7 = vector.broadcast %cst_2 : f32 to vector<4x512xf32>
    %8 = arith.addf %6, %7 : vector<4x512xf32>
    %9 = math.log %8 : vector<4x512xf32>
    %10 = arith.mulf %9, %4 : vector<4x512xf32>
    %c0_3 = arith.constant 0 : index
    %c0_4 = arith.constant 0 : index
    %11 = vector.load %arg2[%c0_3, %c0_4] : memref<4x512xf32, #tpu.memory_space<vmem>>, vector<4x512xf32>
    tpu.vector_store %arg2[%c0_3, %c0_4], %10 {strides = array<i32>} : memref<4x512xf32, #tpu.memory_space<vmem>>, vector<4x512xf32>,
    return
  }
  func.func @transform_0(%arg0: i32) -> (i32, i32) {
    %c0_i32 = arith.constant 0 : i32
    %c0_i32_0 = arith.constant 0 : i32
    return %arg0, %c0_i32 : i32, i32
  }
  func.func @transform_1(%arg0: i32) -> (i32, i32) {
    %c0_i32 = arith.constant 0 : i32
    %c0_i32_0 = arith.constant 0 : i32
    return %arg0, %c0_i32 : i32, i32
  }
}

</mosaic_0001>

<bundles_post_ra>
// kernel: tpu_custom_call.1
= control target key start
LH: loop header
LB: loop body
LE: loop exit
PB: predicated region body
PF: predicated region fallthrough
CT: control target
= control target key end

     0   :  { %6 = vsyncpa [#allocation3], 0  ;;  %s150_s0 = inlined_call_operand.hbm [shape: f32[4,512], index: 0, kind: input, shape index: {}]   ;;  %s151_s1 = inlined_call_operand.hbm [shape: f32[4,512], index: 1, kind: output, shape index: {}]  }
   0x1   :  { %7 = vsyncpa [#allocation4], 0  ;;  %s113_s6 = smov [#allocation2]   ;;  %s65_s10 = scalar_lea.hbm %s150_s0, 256 }
   0x2   :  { %s14_s7 = sshll.u32 %s113_s6, 4  ;;  %p66_p0 = scmp.ne.s32.totalorder %s150_s0, %s65_s10  ;;  %s15_s7 = int_to_ptr.vmem [resolvable:$true] %s14_s7 }
   0x3   :  { %p69_p1 = scmp.lt.u32.totalorder %s65_s10, %s150_s0 }
   0x5   :  { %p71_p2 = pnand %p69_p1, %p66_p0 }
   0x7   :  { %74 = shalt.err (!%p71_p2)
}
   0x8   :  { %s75_s15 = scalar_lea.vmem %s15_s7, 256  ;;  %p80_p4 = scmp.lt.s32.totalorder %s15_s7, %s15_s7 }
   0x9   :  { %p76_p3 = scmp.ne.s32.totalorder %s15_s7, %s75_s15  ;;  %p81_p5 = scmp.lt.s32.totalorder %s75_s15, %s75_s15 }
   0xb   :  { %p82_p6 = por %p81_p5, %p80_p4 }
   0xd   :  { %p83_p7 = pnand %p82_p6, %p76_p3 }
   0xf   :  { %86 = shalt.err (!%p83_p7)
}
  0x10   :  { %17 = dma.hbm_to_vmem [thread:$0]  %s150_s0, 256, %s15_s7, [#allocation3]  }
  0x11   :  { %109 = dma.done.wait [#allocation3], 256  }
  0x12   :  { %110 = vsyncadd [#allocation3], 4294967040  ;;  %v21_v0 = vld [vmem:[#allocation2] sm:$0xff]  ;;  %v22_v1 = vld [vmem:[#allocation2 + $0x8] sm:$0xff]  ;;  %v114_v7 = vmov 0.0   ;;  %s115_s18 = smov [#allocation5]  }
  0x13   :  { %v29_v2 = vmax.f32 %v21_v0, 0.0  ;;  %v30_v3 = vmax.f32 %v22_v1, 0.0  ;;  %vm23_vm0 = vcmp.gt.f32.partialorder %v21_v0, 0.0  ;;  %vm24_vm1 = vcmp.gt.f32.partialorder %v22_v1, 0.0  ;;  %s47_s0 = sshll.u32 %s115_s18, 4  ;;  %s48_s0 = int_to_ptr.vmem [resolvable:$true] %s47_s0 }
  0x14   :  { %v56_v8 = vsel %vm23_vm0, 1.0, %v114_v7  ;;  %v57_v11 = vsel %vm24_vm1, 1.0, %v114_v7  ;;  %s87_s19 = scalar_lea.vmem %s48_s0, 256  ;;  %p92_p9 = scmp.lt.s32.totalorder %s48_s0, %s48_s0 }
  0x15   :  { %v31_v4 = vadd.f32 1e-10, %v29_v2  ;;  %v32_v5 = vadd.f32 1e-10, %v30_v3  ;;  %p88_p8 = scmp.ne.s32.totalorder %s48_s0, %s87_s19  ;;  %p93_p10 = scmp.lt.s32.totalorder %s87_s19, %s87_s19 }
  0x17   :  { %61 = vlog2.f32 %v31_v4  ;;  %p94_p11 = por %p93_p10, %p92_p9 }
  0x18   :  { %63 = vlog2.f32 %v32_v5 }
  0x19   :  { %p95_p12 = pnand %p94_p11, %p88_p8 }
  0x21   :  { %v62_v6 = vpop.eup %61 }
  0x22   :  { %v64_v9 = vpop.eup %63  ;;  %v34_v10 = vmul.f32 0.6931472, %v62_v6 }
  0x23   :  { %v36_v12 = vmul.f32 0.6931472, %v64_v9 }
  0x24   :  { %v37_v13 = vmul.f32 %v56_v8, %v34_v10 }
  0x25   :  { %v38_v14 = vmul.f32 %v57_v11, %v36_v12 }
  0x26   :  { %39 = vst [vmem:[#allocation5] sm:$0xff] %v37_v13 }
  0x27   :  { %40 = vst [vmem:[#allocation5 + $0x8] sm:$0xff] %v38_v14 }
  0x28   :  { %98 = shalt.err (!%p95_p12)
}
  0x29   :  { %s99_s22 = scalar_lea.hbm %s151_s1, 256 }
  0x2a   :  { %p100_p13 = scmp.ne.s32.totalorder %s151_s1, %s99_s22  ;;  %p103_p0 = scmp.lt.u32.totalorder %s99_s22, %s151_s1 }
  0x2c   :  { %p105_p1 = pnand %p103_p0, %p100_p13 }
  0x2e   :  { %108 = shalt.err (!%p105_p1)
}
  0x2f   :  { %50 = dma.vmem_to_hbm [thread:$0]  %s48_s0, 256, %s151_s1, [#allocation4]  }
  0x30   :  { %111 = dma.done.wait [#allocation4], 256  }
  0x31   :  { %112 = vsyncadd [#allocation4], 4294967040 }
  0x32   :  { %54 = vsyncpa [#allocation3], 1 }
  0x33   :  { %55 = vsyncpa [#allocation4], 1 }

</bundles_post_ra>
